<compile_context>
chip_gen: v7x
topology: tpu7x:2x2x1
jax: 0.10.0
libtpu: 0.0.40
codegen_flags: <defaults>
</compile_context>

<pallas_src>
from functools import partial

import jax
import jax.numpy as jnp
from jax.experimental import pallas as pl
from jax.experimental.pallas import tpu as pltpu

LANE = 128


def _round_up(n, m):
    return ((n + m - 1) // m) * m


def _pick_tm(batch):
    """Batch-tile choice per TPU generation.

    v5e/v6e have a single TensorCore -> one big tile (grid collapses to 1 step).
    v7x has 2 TensorCores -> keep two parallel 128-row tiles so both cores work.
    """
    try:
        kind = jax.devices()[0].device_kind.lower()
    except Exception:
        kind = ""
    tm = 128 if ("v7" in kind and batch >= 256) else 256
    return min(tm, _round_up(batch, 8))


def seq2_fused_kernel(x_ref, wf_ref, bf_ref, o_ref):
    # Single fused affine op. x arrives in f32 (no wrapper pre-pass); the
    # f32->bf16 cast is a free VPU op here, the dot accumulates in f32 on the
    # MXU, and the bias add / downcast epilogue stays on the VPU.
    xb = x_ref[...].astype(wf_ref.dtype)
    y = jnp.dot(xb, wf_ref[...], preferred_element_type=jnp.float32)
    o_ref[...] = (y + bf_ref[...]).astype(o_ref.dtype)


def prepare_fused_params(w1, b1, w2, b2, compute_dtype=jnp.bfloat16):
    """One-time (model-load) fusion + padding of the two nn.Linear layers.

    PyTorch convention: w1 is (HID, IN), w2 is (OUT, HID).
    Returns (wf_padded (IN, OUT_pad) bf16, bf_padded (1, OUT_pad) f32, out_dim).
    """
    _, in_dim = w1.shape
    out_dim = w2.shape[0]
    out_p = _round_up(out_dim, LANE)

    w1f = w1.astype(jnp.float32)
    w2f = w2.astype(jnp.float32)
    wf = w1f.T @ w2f.T                                    # (IN, OUT), f32
    bf = w2f @ b1.astype(jnp.float32) + b2.astype(jnp.float32)  # (OUT,), f32

    wf_p = jnp.zeros((in_dim, out_p), compute_dtype).at[:, :out_dim].set(
        wf.astype(compute_dtype))
    bf_p = jnp.zeros((1, out_p), jnp.float32).at[:, :out_dim].set(
        bf.reshape(1, -1))
    return wf_p, bf_p, out_dim


@partial(jax.jit, static_argnames=("out_dim", "tm"))
def sequential2_fused(x, wf_p, bf_p, *, out_dim, tm):
    """Fused y = b(a(x)) for two stacked Linears (PyTorch convention)."""
    B, in_dim = x.shape
    out_p = wf_p.shape[1]
    b_p = _round_up(B, tm)

    # Only pad the batch dim if it does not divide the tile (no-op here).
    xp = x if b_p == B else jnp.zeros((b_p, in_dim), x.dtype).at[:B].set(x)

    grid = (b_p // tm,)

    # True logical work / traffic (fused affine), not padded-dim inflation.
    cost = pl.CostEstimate(
        flops=2 * B * in_dim * out_dim,
        transcendentals=0,
        bytes_accessed=(B * in_dim * x.dtype.itemsize          # x (f32, unpadded K)
                        + wf_p.size * wf_p.dtype.itemsize      # fused weight (bf16)
                        + bf_p.size * 4                        # fused bias (f32)
                        + b_p * out_p * 2))                    # bf16 output slab

    out = pl.pallas_call(
        seq2_fused_kernel,
        out_shape=jax.ShapeDtypeStruct((b_p, out_p), jnp.bfloat16),
        grid=grid,
        in_specs=[
            pl.BlockSpec((tm, in_dim), lambda i: (i, 0)),     # x row tile, full K
            pl.BlockSpec((in_dim, out_p), lambda i: (0, 0)),  # fused W (resident)
            pl.BlockSpec((1, out_p), lambda i: (0, 0)),       # fused bias (resident)
        ],
        out_specs=pl.BlockSpec((tm, out_p), lambda i: (i, 0)),
        compiler_params=pltpu.CompilerParams(
            dimension_semantics=("parallel",)),
        cost_estimate=cost,
    )(xp, wf_p, bf_p)

    return out[:B, :out_dim].astype(x.dtype)


if __name__ == "__main__":
    BATCH, IN, HID, OUT = 256, 32, 64, 16

    key = jax.random.PRNGKey(0)
    kx, k1, kb1, k2, kb2 = jax.random.split(key, 5)

    x = jax.random.normal(kx, (BATCH, IN), dtype=jnp.float32)

    # Params with nn.Linear(IN, HID) / nn.Linear(HID, OUT) shapes.
    w1 = jax.random.normal(k1, (HID, IN), dtype=jnp.float32) * (1.0 / IN ** 0.5)
    b1 = jax.random.normal(kb1, (HID,), dtype=jnp.float32) * 0.01
    w2 = jax.random.normal(k2, (OUT, HID), dtype=jnp.float32) * (1.0 / HID ** 0.5)
    b2 = jax.random.normal(kb2, (OUT,), dtype=jnp.float32) * 0.01

    # --- model-load time: fuse + pad once, outside the hot path -------------
    wf_p, bf_p, out_dim = prepare_fused_params(w1, b1, w2, b2)
    jax.block_until_ready((wf_p, bf_p))

    tm = _pick_tm(BATCH)
    out = sequential2_fused(x, wf_p, bf_p, out_dim=out_dim, tm=tm)
    jax.block_until_ready(out)
    assert out.shape == (BATCH, OUT)

    # Tight check mirroring the kernel's bf16-in / f32-accumulate / bf16-out path.
    wf = w1.T @ w2.T
    bf = w2 @ b1 + b2
    xq = x.astype(jnp.bfloat16).astype(jnp.float32)
    wfq = wf.astype(jnp.bfloat16).astype(jnp.float32)
    ref_q = (xq @ wfq + bf.reshape(1, -1)).astype(jnp.bfloat16).astype(jnp.float32)
    assert jnp.allclose(out, ref_q, atol=3e-2, rtol=3e-2)

    # Loose semantic check vs. the pure-f32 PyTorch-equivalent forward b(a(x)).
    # (The kernel intentionally runs the MXU in bf16 with f32 accumulation.)
    ref_f32 = (x @ w1.T + b1.reshape(1, -1)) @ w2.T + b2.reshape(1, -1)
    assert jnp.allclose(out, ref_f32, atol=1e-1, rtol=1e-1)

    print("KERNEL_OK")
</pallas_src>

<mosaic_0001>
module attributes {stable_mosaic.version = 11 : i64} {
  func.func @seq2_fused_kernel(%arg0: i32, %arg1: memref<256x32xf32, #tpu.memory_space<vmem>>, %arg2: memref<32x128xbf16, #tpu.memory_space<vmem>>, %arg3: memref<1x128xf32, #tpu.memory_space<vmem>>, %arg4: memref<256x128xbf16, #tpu.memory_space<vmem>>) attributes {dimension_semantics = [#tpu.dimension_semantics<parallel>], iteration_bounds = array<i64: 1>, scalar_prefetch = 0 : i64, scratch_operands = 0 : i64, tpu.core_type = #tpu.core_type<tc>, window_params = [{transform_indices = @transform_0, window_bounds = array<i64: 256, 32>}, {pipeline_mode = #tpu.pipeline_mode<synchronous>, transform_indices = @transform_1, window_bounds = array<i64: 32, 128>}, {pipeline_mode = #tpu.pipeline_mode<synchronous>, transform_indices = @transform_2, window_bounds = array<i64: 1, 128>}, {transform_indices = @transform_3, window_bounds = array<i64: 256, 128>}]} {
    %c0 = arith.constant 0 : index
    %c0_0 = arith.constant 0 : index
    %0 = vector.load %arg1[%c0, %c0_0] : memref<256x32xf32, #tpu.memory_space<vmem>>, vector<256x32xf32>
    %1 = arith.truncf %0 : vector<256x32xf32> to vector<256x32xbf16>
    %c0_1 = arith.constant 0 : index
    %c0_2 = arith.constant 0 : index
    %2 = vector.load %arg2[%c0_1, %c0_2] : memref<32x128xbf16, #tpu.memory_space<vmem>>, vector<32x128xbf16>
    %cst = arith.constant dense<0.000000e+00> : vector<256x128xf32>
    %3 = tpu.matmul %1, %2, %cst {dimension_numbers = #tpu.dot_dimension_numbers<[1], [0], [0], [1], [0, 0, 1, 1], [], []>} : vector<256x32xbf16>, vector<32x128xbf16>, vector<256x128xf32> -> vector<256x128xf32>
    %c0_3 = arith.constant 0 : index
    %c0_4 = arith.constant 0 : index
    %4 = vector.load %arg3[%c0_3, %c0_4] : memref<1x128xf32, #tpu.memory_space<vmem>>, vector<1x128xf32>
    %5 = vector.broadcast %4 : vector<1x128xf32> to vector<256x128xf32>
    %6 = arith.addf %3, %5 : vector<256x128xf32>
    %7 = arith.truncf %6 : vector<256x128xf32> to vector<256x128xbf16>
    %c0_5 = arith.constant 0 : index
    %c0_6 = arith.constant 0 : index
    %8 = vector.load %arg4[%c0_5, %c0_6] : memref<256x128xbf16, #tpu.memory_space<vmem>>, vector<256x128xbf16>
    tpu.vector_store %arg4[%c0_5, %c0_6], %7 {strides = array<i32>} : memref<256x128xbf16, #tpu.memory_space<vmem>>, vector<256x128xbf16>,
    return
  }
  func.func @transform_0(%arg0: i32) -> (i32, i32) {
    %c0_i32 = arith.constant 0 : i32
    %c0_i32_0 = arith.constant 0 : i32
    return %arg0, %c0_i32 : i32, i32
  }
  func.func @transform_1(%arg0: i32) -> (i32, i32) {
    %c0_i32 = arith.constant 0 : i32
    %c0_i32_0 = arith.constant 0 : i32
    %c0_i32_1 = arith.constant 0 : i32
    return %c0_i32, %c0_i32_0 : i32, i32
  }
  func.func @transform_2(%arg0: i32) -> (i32, i32) {
    %c0_i32 = arith.constant 0 : i32
    %c0_i32_0 = arith.constant 0 : i32
    %c0_i32_1 = arith.constant 0 : i32
    return %c0_i32, %c0_i32_0 : i32, i32
  }
  func.func @transform_3(%arg0: i32) -> (i32, i32) {
    %c0_i32 = arith.constant 0 : i32
    %c0_i32_0 = arith.constant 0 : i32
    return %arg0, %c0_i32 : i32, i32
  }
}

</mosaic_0001>

<bundles_post_ra>
// kernel: sequential2_fused.1
= control target key start
LH: loop header
LB: loop body
LE: loop exit
PB: predicated region body
PF: predicated region fallthrough
CT: control target
= control target key end

     0   :  { %vm86_vm0 = vcmask 261120   ;;  %s921_s1 = inlined_call_operand.vmem [shape: bf16[32,128], index: 1, kind: input, shape index: {}]   ;;  %s922_s0 = inlined_call_operand.vmem [shape: f32[256,32], index: 0, kind: input, shape index: {}]   ;;  %s923_s2 = inlined_call_operand.vmem [shape: f32[1,128], index: 2, kind: input, shape index: {}]   ;;  %s924_s3 = inlined_call_operand.vmem [shape: bf16[256,128], index: 3, kind: output, shape index: {}]  }
   0x1   :  { %v696_v0 = vld [vmem:[%s921_s1] sm:$0xff]   ;;  %v697_v1 = vld [vmem:[%s921_s1 + $0x8] sm:$0xff]   ;;  %v17_v7 = vld [vmem:[%s922_s0 + $0x10] sm:$0xff] }
   0x2   :  { %656 = vmatprep.subr.bf16.mxu0 %v696_v0  ;;  %692 = vmatprep.subr.bf16.mxu1 %v696_v0  ;;  %v15_v2 = vld [vmem:[%s922_s0] sm:$0xff]  ;;  %v16_v3 = vld [vmem:[%s922_s0 + $0x8] sm:$0xff]  ;;  %v18_v8 = vld [vmem:[%s922_s0 + $0x18] sm:$0xff] }
   0x3   :  { %v31_v4 = vld [vmem:[%s922_s0 + $0x80] sm:$0xff]  ;;  %657 = vmatpush3.bf16.msra.mxu0 %v696_v0  ;;  %694 = vmatpush3.bf16.msra.mxu1 %v696_v0  ;;  %v47_v5 = vpack.c.bf16 %v16_v3, %v15_v2  ;;  %v32_v6 = vld [vmem:[%s922_s0 + $0x88] sm:$0xff]  ;;  %v33_v10 = vld [vmem:[%s922_s0 + $0x90] sm:$0xff]  ;;  %v48_v16 = vpack.c.bf16 %v18_v8, %v17_v7 }
   0x4   :  { %658 = vmatprep.subr.bf16.mxu0 %v697_v1  ;;  %693 = vmatprep.subr.bf16.mxu1 %v697_v1  ;;  %v55_v9 = vpack.c.bf16 %v32_v6, %v31_v4  ;;  %v34_v11 = vld [vmem:[%s922_s0 + $0x98] sm:$0xff]  ;;  %v19_v12 = vld [vmem:[%s922_s0 + $0x20] sm:$0xff]  ;;  %v20_v13 = vld [vmem:[%s922_s0 + $0x28] sm:$0xff] }
   0x5   :  { %660 = vmatprep.mubr.msk.bf16.mxu0 %vm86_vm0, %v47_v5  ;;  %v35_v14 = vld [vmem:[%s922_s0 + $0xa0] sm:$0xff]  ;;  %v36_v15 = vld [vmem:[%s922_s0 + $0xa8] sm:$0xff]  ;;  %v56_v17 = vpack.c.bf16 %v34_v11, %v33_v10  ;;  %v49_v18 = vpack.c.bf16 %v20_v13, %v19_v12  ;;  %v21_v20 = vld [vmem:[%s922_s0 + $0x30] sm:$0xff] }
   0x6   :  { %676 = vmatprep.mubr.msk.bf16.mxu1 %vm86_vm0, %v55_v9  ;;  %v57_v19 = vpack.c.bf16 %v36_v15, %v35_v14  ;;  %v22_v21 = vld [vmem:[%s922_s0 + $0x38] sm:$0xff]  ;;  %v37_v22 = vld [vmem:[%s922_s0 + $0xb0] sm:$0xff]  ;;  %v23_v24 = vld [vmem:[%s922_s0 + $0x40] sm:$0xff] }
   0x7   :  { %659 = vmatpush3.bf16.msra.mxu0 %v697_v1  ;;  %695 = vmatpush3.bf16.msra.mxu1 %v697_v1  ;;  %v38_v23 = vld [vmem:[%s922_s0 + $0xb8] sm:$0xff]  ;;  %v24_v25 = vld [vmem:[%s922_s0 + $0x48] sm:$0xff]  ;;  %v39_v26 = vld [vmem:[%s922_s0 + $0xc0] sm:$0xff]  ;;  %v50_v28 = vpack.c.bf16 %v22_v21, %v21_v20 }
   0x8   :  { %v40_v27 = vld [vmem:[%s922_s0 + $0xc8] sm:$0xff]  ;;  %v58_v29 = vpack.c.bf16 %v38_v23, %v37_v22  ;;  %v51_v30 = vpack.c.bf16 %v24_v25, %v23_v24  ;;  %v25_v32 = vld [vmem:[%s922_s0 + $0x50] sm:$0xff]  ;;  %v26_v33 = vld [vmem:[%s922_s0 + $0x58] sm:$0xff] }
   0x9   :  { %v59_v31 = vpack.c.bf16 %v40_v27, %v39_v26  ;;  %v41_v34 = vld [vmem:[%s922_s0 + $0xd0] sm:$0xff]  ;;  %v42_v35 = vld [vmem:[%s922_s0 + $0xd8] sm:$0xff]  ;;  %v27_v36 = vld [vmem:[%s922_s0 + $0x60] sm:$0xff]  ;;  %v52_v40 = vpack.c.bf16 %v26_v33, %v25_v32 }
   0xa   :  { %661 = vmatmul.mubr.msk.bf16.vlgmr.msra.gmra.mrb[0].mxu0 %vm86_vm0, %v48_v16  ;;  %677 = vmatmul.mubr.msk.bf16.vlgmr.msra.gmra.mrb[0].mxu1 %vm86_vm0, %v56_v17  ;;  %v28_v37 = vld [vmem:[%s922_s0 + $0x68] sm:$0xff]  ;;  %v43_v38 = vld [vmem:[%s922_s0 + $0xe0] sm:$0xff]  ;;  %v60_v41 = vpack.c.bf16 %v42_v35, %v41_v34  ;;  %v29_v44 = vld [vmem:[%s922_s0 + $0x70] sm:$0xff] }
   0xb   :  { %664 = vmatprep.mubr.msk.bf16.mxu0 %vm86_vm0, %v49_v18  ;;  %680 = vmatprep.mubr.msk.bf16.mxu1 %vm86_vm0, %v57_v19  ;;  %v44_v39 = vld [vmem:[%s922_s0 + $0xe8] sm:$0xff]  ;;  %v53_v42 = vpack.c.bf16 %v28_v37, %v27_v36  ;;  %v30_v45 = vld [vmem:[%s922_s0 + $0x78] sm:$0xff]  ;;  %v45_v46 = vld [vmem:[%s922_s0 + $0xf0] sm:$0xff] }
   0xc   :  { %v61_v43 = vpack.c.bf16 %v44_v39, %v43_v38  ;;  %v46_v47 = vld [vmem:[%s922_s0 + $0xf8] sm:$0xff]  ;;  %v54_v48 = vpack.c.bf16 %v30_v45, %v29_v44  ;;  %v839_v51 = vld [vmem:[%s923_s2] ss:$0 sm:$0xff] }
   0xd   :  { %v62_v49 = vpack.c.bf16 %v46_v47, %v45_v46 }
  0x12   :  { %665 = vmatmul.mubr.msk.bf16.gmra.mrb[4].mxu0 %vm86_vm0, %v50_v28  ;;  %681 = vmatmul.mubr.msk.bf16.gmra.mrb[4].mxu1 %vm86_vm0, %v58_v29 }
  0x13   :  { %668 = vmatprep.mubr.msk.bf16.mxu0 %vm86_vm0, %v51_v30  ;;  %684 = vmatprep.mubr.msk.bf16.mxu1 %vm86_vm0, %v59_v31 }
  0x1a   :  { %669 = vmatmul.mubr.msk.bf16.gmra.mrb[8].mxu0 %vm86_vm0, %v52_v40  ;;  %685 = vmatmul.mubr.msk.bf16.gmra.mrb[8].mxu1 %vm86_vm0, %v60_v41 }
  0x1b   :  { %672 = vmatprep.mubr.msk.bf16.mxu0 %vm86_vm0, %v53_v42  ;;  %688 = vmatprep.mubr.msk.bf16.mxu1 %vm86_vm0, %v61_v43 }
  0x22   :  { %673 = vmatmul.mubr.msk.bf16.gmra.mrb[12].mxu0 %vm86_vm0, %v54_v48  ;;  %689 = vmatmul.mubr.msk.bf16.gmra.mrb[12].mxu1 %vm86_vm0, %v62_v49 }
  0xdd   :  { %v662_v50 = vpop.f32.mrb[0].mxu0  ;;  %v678_v52 = vpop.f32.mrb[0].mxu1 }
  0xde   :  { %v169_v53 = vpop.f32.mrb[1].mxu0  ;;  %v233_v54 = vpop.f32.mrb[1].mxu1  ;;  %v178_v57 = vadd.f32 %v662_v50, %v839_v51  ;;  %v242_v58 = vadd.f32 %v678_v52, %v839_v51 }
  0xdf   :  { %v663_v55 = vpop.f32.mrb[2].mxu0  ;;  %v679_v56 = vpop.f32.mrb[2].mxu1  ;;  %v170_v63 = vadd.f32 %v839_v51, %v169_v53  ;;  %v234_v0 = vadd.f32 %v839_v51, %v233_v54 }
  0xe0   :  { %v181_v59 = vadd.f32 %v663_v55, %v839_v51  ;;  %v245_v60 = vadd.f32 %v679_v56, %v839_v51  ;;  %v172_v61 = vpop.f32.mrb[3].mxu0  ;;  %v236_v62 = vpop.f32.mrb[3].mxu1 }
  0xe1   :  { %v173_v1 = vadd.f32 %v839_v51, %v172_v61  ;;  %v237_v2 = vadd.f32 %v839_v51, %v236_v62 }
  0xe2   :  { %v551_v3 = vpack.c.bf16 %v181_v59, %v178_v57  ;;  %v591_v4 = vpack.c.bf16 %v245_v60, %v242_v58 }
  0xe3   :  { %v546_v5 = vpack.c.bf16 %v173_v1, %v170_v63  ;;  %v586_v6 = vpack.c.bf16 %v237_v2, %v234_v0 }
  0xe4   :  { %623 = vst [vmem:[%s924_s3 + $0x8] sm:$0xff] %v551_v3   ;;  %631 = vst [vmem:[%s924_s3 + $0x48] sm:$0xff] %v591_v4  }
  0xe5   :  { %547 = vst [vmem:[%s924_s3] sm:$0xff] %v546_v5   ;;  %630 = vst [vmem:[%s924_s3 + $0x40] sm:$0xff] %v586_v6   ;;  %v666_v7 = vpop.f32.mrb[4].mxu0  ;;  %v682_v8 = vpop.f32.mrb[4].mxu1 }
  0xe6   :  { %v185_v9 = vpop.f32.mrb[5].mxu0  ;;  %v249_v10 = vpop.f32.mrb[5].mxu1  ;;  %v194_v13 = vadd.f32 %v666_v7, %v839_v51  ;;  %v258_v14 = vadd.f32 %v682_v8, %v839_v51 }
  0xe7   :  { %v667_v11 = vpop.f32.mrb[6].mxu0  ;;  %v683_v12 = vpop.f32.mrb[6].mxu1  ;;  %v186_v19 = vadd.f32 %v839_v51, %v185_v9  ;;  %v250_v20 = vadd.f32 %v839_v51, %v249_v10 }
  0xe8   :  { %v197_v15 = vadd.f32 %v667_v11, %v839_v51  ;;  %v261_v16 = vadd.f32 %v683_v12, %v839_v51  ;;  %v188_v17 = vpop.f32.mrb[7].mxu0  ;;  %v252_v18 = vpop.f32.mrb[7].mxu1 }
  0xe9   :  { %v189_v21 = vadd.f32 %v839_v51, %v188_v17  ;;  %v253_v22 = vadd.f32 %v839_v51, %v252_v18 }
  0xea   :  { %v561_v23 = vpack.c.bf16 %v197_v15, %v194_v13  ;;  %v601_v24 = vpack.c.bf16 %v261_v16, %v258_v14 }
  0xeb   :  { %v556_v25 = vpack.c.bf16 %v189_v21, %v186_v19  ;;  %v596_v26 = vpack.c.bf16 %v253_v22, %v250_v20 }
  0xec   :  { %625 = vst [vmem:[%s924_s3 + $0x18] sm:$0xff] %v561_v23   ;;  %633 = vst [vmem:[%s924_s3 + $0x58] sm:$0xff] %v601_v24  }
  0xed   :  { %624 = vst [vmem:[%s924_s3 + $0x10] sm:$0xff] %v556_v25   ;;  %632 = vst [vmem:[%s924_s3 + $0x50] sm:$0xff] %v596_v26   ;;  %v670_v27 = vpop.f32.mrb[8].mxu0  ;;  %v686_v28 = vpop.f32.mrb[8].mxu1 }
  0xee   :  { %v201_v29 = vpop.f32.mrb[9].mxu0  ;;  %v265_v30 = vpop.f32.mrb[9].mxu1  ;;  %v210_v33 = vadd.f32 %v670_v27, %v839_v51  ;;  %v274_v34 = vadd.f32 %v686_v28, %v839_v51 }
  0xef   :  { %v671_v31 = vpop.f32.mrb[10].mxu0  ;;  %v687_v32 = vpop.f32.mrb[10].mxu1  ;;  %v202_v39 = vadd.f32 %v839_v51, %v201_v29  ;;  %v266_v40 = vadd.f32 %v839_v51, %v265_v30 }
  0xf0   :  { %v213_v35 = vadd.f32 %v671_v31, %v839_v51  ;;  %v277_v36 = vadd.f32 %v687_v32, %v839_v51  ;;  %v204_v37 = vpop.f32.mrb[11].mxu0  ;;  %v268_v38 = vpop.f32.mrb[11].mxu1 }
  0xf1   :  { %v205_v41 = vadd.f32 %v839_v51, %v204_v37  ;;  %v269_v42 = vadd.f32 %v839_v51, %v268_v38 }
  0xf2   :  { %v571_v43 = vpack.c.bf16 %v213_v35, %v210_v33  ;;  %v611_v44 = vpack.c.bf16 %v277_v36, %v274_v34 }
  0xf3   :  { %v566_v45 = vpack.c.bf16 %v205_v41, %v202_v39  ;;  %v606_v46 = vpack.c.bf16 %v269_v42, %v266_v40 }
  0xf4   :  { %627 = vst [vmem:[%s924_s3 + $0x28] sm:$0xff] %v571_v43   ;;  %635 = vst [vmem:[%s924_s3 + $0x68] sm:$0xff] %v611_v44  }
  0xf5   :  { %626 = vst [vmem:[%s924_s3 + $0x20] sm:$0xff] %v566_v45   ;;  %634 = vst [vmem:[%s924_s3 + $0x60] sm:$0xff] %v606_v46   ;;  %v674_v47 = vpop.f32.mrb[12].mxu0  ;;  %v690_v48 = vpop.f32.mrb[12].mxu1 }
  0xf6   :  { %v217_v49 = vpop.f32.mrb[13].mxu0  ;;  %v281_v50 = vpop.f32.mrb[13].mxu1  ;;  %v226_v54 = vadd.f32 %v674_v47, %v839_v51  ;;  %v290_v55 = vadd.f32 %v690_v48, %v839_v51 }
  0xf7   :  { %v675_v52 = vpop.f32.mrb[14].mxu0  ;;  %v691_v53 = vpop.f32.mrb[14].mxu1  ;;  %v218_v60 = vadd.f32 %v839_v51, %v217_v49  ;;  %v282_v61 = vadd.f32 %v839_v51, %v281_v50 }
  0xf8   :  { %v229_v56 = vadd.f32 %v675_v52, %v839_v51  ;;  %v293_v57 = vadd.f32 %v691_v53, %v839_v51  ;;  %v220_v58 = vpop.f32.mrb[15].mxu0  ;;  %v284_v59 = vpop.f32.mrb[15].mxu1 }
  0xf9   :  { %v221_v62 = vadd.f32 %v839_v51, %v220_v58  ;;  %v285_v63 = vadd.f32 %v839_v51, %v284_v59 }
  0xfa   :  { %v581_v0 = vpack.c.bf16 %v229_v56, %v226_v54  ;;  %v621_v1 = vpack.c.bf16 %v293_v57, %v290_v55 }
  0xfb   :  { %v576_v2 = vpack.c.bf16 %v221_v62, %v218_v60  ;;  %v616_v3 = vpack.c.bf16 %v285_v63, %v282_v61 }
  0xfc   :  { %629 = vst [vmem:[%s924_s3 + $0x38] sm:$0xff] %v581_v0   ;;  %637 = vst [vmem:[%s924_s3 + $0x78] sm:$0xff] %v621_v1  }
  0xfd   :  { %628 = vst [vmem:[%s924_s3 + $0x30] sm:$0xff] %v576_v2   ;;  %636 = vst [vmem:[%s924_s3 + $0x70] sm:$0xff] %v616_v3  }

</bundles_post_ra>
